<compile_context>
chip_gen: v6e
topology: v6e:2x2x1
jax: 0.10.0
libtpu: 0.0.40
codegen_flags: <defaults>
</compile_context>

<pallas_src>
import functools

import jax
import jax.numpy as jnp
from jax.experimental import pallas as pl
from jax.experimental.pallas import tpu as pltpu

LN_EPS = 1e-5


def _round_up(n, m):
    return ((n + m - 1) // m) * m


def _vmem_budget_bytes():
    """~80% of physical VMEM (headroom for compiler scratch); safe fallback."""
    cap = 64 * 1024 * 1024
    try:
        info = pltpu.get_tpu_info()
        cap = int(getattr(info, "vmem_capacity_bytes", cap) or cap)
    except Exception:
        pass
    return max(16 * 1024 * 1024, int(cap * 0.8))


def _proj_kernel(x_ref, gamma_ref, beta_ref, w_ref, bias_ref, o_ref, xn_ref,
                 *, hoist_ln):
    # x_ref:     (TM, H)   input rows (native dtype)
    # gamma_ref: (1, H)    LayerNorm scale, f32 (pre-cast in wrapper)
    # beta_ref:  (1, H)    LayerNorm shift, f32
    # w_ref:     (H, TN)   weight N-tile, MXU feed dtype (bf16)
    # bias_ref:  (1, TN)   bias N-tile, f32
    # o_ref:     (TM, TN)  output tile (TN multiple of 128 -> dense stores)
    # xn_ref:    (TM, H)   VMEM scratch holding LayerNorm'd rows (feed dtype)

    def compute_xn():
        x = x_ref[...].astype(jnp.float32)
        # Single-pass statistics; clamp var >= 0 (cancellation safety).
        mu = jnp.mean(x, axis=-1, keepdims=True)
        m2 = jnp.mean(x * x, axis=-1, keepdims=True)
        var = jnp.maximum(m2 - mu * mu, 0.0)
        xn = (x - mu) * jax.lax.rsqrt(var + LN_EPS)
        xn = xn * gamma_ref[...] + beta_ref[...]
        xn_ref[...] = xn.astype(xn_ref.dtype)

    if hoist_ln:
        # LN only on the first N tile of each row tile; the scratch carries
        # across the (inner, "arbitrary") N-tile axis.
        pl.when(pl.program_id(1) == 0)(compute_xn)
    else:
        # Row tile changes every step (plan B): recompute per step.
        compute_xn()

    y = jnp.dot(xn_ref[...], w_ref[...], preferred_element_type=jnp.float32)
    o_ref[...] = (y + bias_ref[...]).astype(o_ref.dtype)


def projection_forward(x, gamma, beta, weight, bias, *,
                       Nnodes, output_size, output_dict_size,
                       row_tile=512, n_tile=512,
                       matmul_dtype=jnp.bfloat16):
    """x: (B, SL, H); weight: (F, H) PyTorch Linear convention."""
    B, SL, H = x.shape
    F = output_size * output_dict_size
    assert B % Nnodes == 0
    G = B // Nnodes
    rows = B * SL

    # Fold the trailing (0,2,1,3,4) permute into the kernel I/O: permute the
    # input rows once (rows x H pass; cheaper than transposing the rows x F
    # output) so the kernel writes rows directly in the final layout.
    x2d = jnp.transpose(x.reshape(G, Nnodes, SL, H), (0, 2, 1, 3))
    x2d = x2d.reshape(rows, H)

    # --- N (output-feature) tiling: pick TN first, pad F up to it ----------
    TN = min(_round_up(n_tile, 128), _round_up(F, 128))
    F_pad = _round_up(F, TN)

    # --- M (row) tiling ------------------------------------------------------
    TM = _round_up(min(row_tile, rows), 8)

    # --- VMEM budget and shrink-to-fit --------------------------------------
    xb = jnp.dtype(x.dtype).itemsize
    wb = jnp.dtype(matmul_dtype).itemsize
    ob = jnp.dtype(x.dtype).itemsize
    budget = _vmem_budget_bytes()

    def est(tm, tn):
        return (2 * (tm * H * xb + H * tn * wb + tm * tn * ob)   # dbl-buffered tiles
                + tm * H * wb                                    # xn scratch
                + 2 * (2 * H * 4 + tn * 4))                      # gamma/beta/bias

    while est(TM, TN) > budget and TM > 64:
        TM = _round_up(TM // 2, 8)
    while est(TM, TN) > budget and TN > 256:
        TN -= 128
        F_pad = _round_up(F, TN)

    rows_pad = _round_up(rows, TM)
    if rows_pad != rows:
        x2d = jnp.pad(x2d, ((0, rows_pad - rows), (0, 0)))

    # Weight cast to the MXU feed dtype ONCE in the wrapper (halves the
    # re-streamed HBM bytes); bias/gamma/beta pre-cast to f32.
    w_t = weight.T.astype(matmul_dtype)                      # (H, F)
    bias_p = bias
    if F_pad != F:
        w_t = jnp.pad(w_t, ((0, 0), (0, F_pad - F)))
        bias_p = jnp.pad(bias, (0, F_pad - F))

    gamma2 = gamma.reshape(1, H).astype(jnp.float32)
    beta2 = beta.reshape(1, H).astype(jnp.float32)
    bias2 = bias_p.reshape(1, F_pad).astype(jnp.float32)

    num_i = rows_pad // TM
    num_j = F_pad // TN

    # --- operand streaming order: re-stream the smaller operand -------------
    # plan A (N-tiles inner): weight re-read (num_i - 1) extra times.
    # plan B (row-tiles inner): x re-read (num_j - 1) extra times.
    plan_a_extra = (num_i - 1) * H * F_pad * wb
    plan_b_extra = (num_j - 1) * rows_pad * H * xb
    use_plan_a = plan_a_extra <= plan_b_extra

    kernel = functools.partial(_proj_kernel, hoist_ln=use_plan_a)
    const_map = lambda a, b: (0, 0)
    if use_plan_a:
        grid = (num_i, num_j)
        x_map = lambda i, j: (i, 0)
        w_map = lambda i, j: (0, j)
        b_map = lambda i, j: (0, j)
        o_map = lambda i, j: (i, j)
    else:
        grid = (num_j, num_i)
        x_map = lambda j, i: (i, 0)
        w_map = lambda j, i: (0, j)
        b_map = lambda j, i: (0, j)
        o_map = lambda j, i: (i, j)

    out2d = pl.pallas_call(
        kernel,
        out_shape=jax.ShapeDtypeStruct((rows_pad, F_pad), x.dtype),
        grid_spec=pltpu.PrefetchScalarGridSpec(
            num_scalar_prefetch=0,
            grid=grid,
            in_specs=[
                pl.BlockSpec((TM, H), x_map),      # x rows
                pl.BlockSpec((1, H), const_map),   # gamma (loaded once)
                pl.BlockSpec((1, H), const_map),   # beta  (loaded once)
                pl.BlockSpec((H, TN), w_map),      # weight N-tile
                pl.BlockSpec((1, TN), b_map),      # bias N-tile
            ],
            out_specs=pl.BlockSpec((TM, TN), o_map),
            scratch_shapes=[pltpu.VMEM((TM, H), matmul_dtype)],
        ),
        compiler_params=pltpu.CompilerParams(
            # Outer axis sharded across megacore TCs; inner axis carries the
            # xn scratch (plan A) so it stays "arbitrary".
            dimension_semantics=("parallel", "arbitrary"),
            vmem_limit_bytes=budget),
    )(x2d, gamma2, beta2, w_t, bias2)

    out2d = out2d[:rows, :F]
    # Input rows were pre-permuted, so this is already the final layout:
    # (B//Nnodes, SL, Nnodes, output_size, output_dict_size) -- no transpose.
    return out2d.reshape(G, SL, Nnodes, output_size, output_dict_size)


def _reference_forward(x, gamma, beta, weight, bias, *,
                       Nnodes, output_size, output_dict_size,
                       matmul_dtype=jnp.float32):
    B, SL, H = x.shape
    xf = x.astype(jnp.float32)
    mu = jnp.mean(xf, axis=-1, keepdims=True)
    var = jnp.mean((xf - mu) ** 2, axis=-1, keepdims=True)
    xn = (xf - mu) / jnp.sqrt(var + LN_EPS) * gamma + beta
    y = jnp.dot(xn.astype(matmul_dtype), weight.T.astype(matmul_dtype),
                preferred_element_type=jnp.float32) + bias
    y = y.reshape(B // Nnodes, Nnodes, SL, output_size, output_dict_size)
    return jnp.transpose(y, (0, 2, 1, 3, 4)).astype(x.dtype)


if __name__ == "__main__":
    # Small shapes consistent with the module's forward.
    hidden_size = 32
    output_size = 4
    output_dict_size = 8
    Nnodes = 2
    B, SL = 4, 8          # B divisible by Nnodes

    key = jax.random.PRNGKey(0)
    kx, kw, kb, kg, kbt = jax.random.split(key, 5)

    x = jax.random.normal(kx, (B, SL, hidden_size), dtype=jnp.float32)

    # Deterministic synthetic parameters (not a checkpoint load).
    F_out = output_size * output_dict_size
    gamma = 1.0 + 0.1 * jax.random.normal(kg, (hidden_size,), jnp.float32)
    beta = 0.05 * jax.random.normal(kbt, (hidden_size,), jnp.float32)
    weight = jax.random.normal(kw, (F_out, hidden_size), jnp.float32) * (hidden_size ** -0.5)
    bias = 0.01 * jax.random.normal(kb, (F_out,), jnp.float32)

    out = projection_forward(
        x, gamma, beta, weight, bias,
        Nnodes=Nnodes, output_size=output_size, output_dict_size=output_dict_size)
    out = jax.block_until_ready(out)

    assert out.shape == (B // Nnodes, SL, Nnodes, output_size, output_dict_size), out.shape

    # Check against a reference that matches the kernel's numerics
    # (bf16 MXU feed, f32 accumulation) -- tight tolerance.
    ref_bf16 = _reference_forward(
        x, gamma, beta, weight, bias,
        Nnodes=Nnodes, output_size=output_size, output_dict_size=output_dict_size,
        matmul_dtype=jnp.bfloat16)
    assert jnp.allclose(out, ref_bf16, atol=3e-3, rtol=3e-3), \
        "mismatch vs bf16-matched reference"

    # Sanity check against the pure-f32 module semantics (loose tolerance:
    # the kernel deliberately feeds the MXU in bf16 with f32 accumulation).
    ref_f32 = _reference_forward(
        x, gamma, beta, weight, bias,
        Nnodes=Nnodes, output_size=output_size, output_dict_size=output_dict_size,
        matmul_dtype=jnp.float32)
    assert jnp.allclose(out, ref_f32, atol=5e-2, rtol=5e-2), \
        "mismatch vs f32 reference"

    print("KERNEL_OK")
</pallas_src>

<mosaic_0001>
module attributes {stable_mosaic.version = 11 : i64} {
  func.func @_proj_kernel(%arg0: i32, %arg1: i32, %arg2: memref<32x32xf32, #tpu.memory_space<vmem>>, %arg3: memref<1x32xf32, #tpu.memory_space<vmem>>, %arg4: memref<1x32xf32, #tpu.memory_space<vmem>>, %arg5: memref<32x128xbf16, #tpu.memory_space<vmem>>, %arg6: memref<1x128xf32, #tpu.memory_space<vmem>>, %arg7: memref<32x128xf32, #tpu.memory_space<vmem>>, %arg8: memref<32x32xbf16, #tpu.memory_space<vmem>>) attributes {dimension_semantics = [#tpu.dimension_semantics<parallel>, #tpu.dimension_semantics<arbitrary>], iteration_bounds = array<i64: 1, 1>, scalar_prefetch = 0 : i64, scratch_operands = 1 : i64, tpu.core_type = #tpu.core_type<tc>, window_params = [{transform_indices = @transform_0, window_bounds = array<i64: 32, 32>}, {pipeline_mode = #tpu.pipeline_mode<synchronous>, transform_indices = @transform_1, window_bounds = array<i64: 1, 32>}, {pipeline_mode = #tpu.pipeline_mode<synchronous>, transform_indices = @transform_2, window_bounds = array<i64: 1, 32>}, {transform_indices = @transform_3, window_bounds = array<i64: 32, 128>}, {transform_indices = @transform_4, window_bounds = array<i64: 1, 128>}, {transform_indices = @transform_5, window_bounds = array<i64: 32, 128>}]} {
    %c0_i32 = arith.constant 0 : i32
    %0 = arith.cmpi eq, %arg1, %c0_i32 : i32
    %1 = arith.extui %0 : i1 to i32
    %c0_i32_0 = arith.constant 0 : i32
    %2 = arith.cmpi ne, %1, %c0_i32_0 : i32
    scf.if %2 {
      %c0_8 = arith.constant 0 : index
      %c0_9 = arith.constant 0 : index
      %10 = vector.load %arg2[%c0_8, %c0_9] : memref<32x32xf32, #tpu.memory_space<vmem>>, vector<32x32xf32>
      %cst_10 = arith.constant dense<0.000000e+00> : vector<32xf32>
      %11 = vector.multi_reduction <add>, %10, %cst_10 [1] : vector<32x32xf32> to vector<32xf32>
      %12 = vector.shape_cast %11 : vector<32xf32> to vector<32x1xf32>
      %cst_11 = arith.constant 3.200000e+01 : f32
      %13 = vector.broadcast %cst_11 : f32 to vector<32x1xf32>
      %14 = arith.divf %12, %13 : vector<32x1xf32>
      %15 = arith.mulf %10, %10 : vector<32x32xf32>
      %cst_12 = arith.constant dense<0.000000e+00> : vector<32xf32>
      %16 = vector.multi_reduction <add>, %15, %cst_12 [1] : vector<32x32xf32> to vector<32xf32>
      %17 = vector.shape_cast %16 : vector<32xf32> to vector<32x1xf32>
      %cst_13 = arith.constant 3.200000e+01 : f32
      %18 = vector.broadcast %cst_13 : f32 to vector<32x1xf32>
      %19 = arith.divf %17, %18 : vector<32x1xf32>
      %20 = arith.mulf %14, %14 : vector<32x1xf32>
      %21 = arith.subf %19, %20 : vector<32x1xf32>
      %cst_14 = arith.constant 0.000000e+00 : f32
      %22 = vector.broadcast %cst_14 : f32 to vector<32x1xf32>
      %23 = arith.maximumf %21, %22 : vector<32x1xf32>
      %24 = vector.broadcast %14 : vector<32x1xf32> to vector<32x32xf32>
      %25 = arith.subf %10, %24 : vector<32x32xf32>
      %cst_15 = arith.constant 9.99999974E-6 : f32
      %26 = vector.broadcast %cst_15 : f32 to vector<32x1xf32>
      %27 = arith.addf %23, %26 : vector<32x1xf32>
      %28 = math.rsqrt %27 : vector<32x1xf32>
      %29 = vector.broadcast %28 : vector<32x1xf32> to vector<32x32xf32>
      %30 = arith.mulf %25, %29 : vector<32x32xf32>
      %c0_16 = arith.constant 0 : index
      %c0_17 = arith.constant 0 : index
      %31 = vector.load %arg3[%c0_16, %c0_17] : memref<1x32xf32, #tpu.memory_space<vmem>>, vector<1x32xf32>
      %32 = vector.broadcast %31 : vector<1x32xf32> to vector<32x32xf32>
      %33 = arith.mulf %30, %32 : vector<32x32xf32>
      %c0_18 = arith.constant 0 : index
      %c0_19 = arith.constant 0 : index
      %34 = vector.load %arg4[%c0_18, %c0_19] : memref<1x32xf32, #tpu.memory_space<vmem>>, vector<1x32xf32>
      %35 = vector.broadcast %34 : vector<1x32xf32> to vector<32x32xf32>
      %36 = arith.addf %33, %35 : vector<32x32xf32>
      %37 = arith.truncf %36 : vector<32x32xf32> to vector<32x32xbf16>
      %c0_20 = arith.constant 0 : index
      %c0_21 = arith.constant 0 : index
      %38 = vector.load %arg8[%c0_20, %c0_21] : memref<32x32xbf16, #tpu.memory_space<vmem>>, vector<32x32xbf16>
      tpu.vector_store %arg8[%c0_20, %c0_21], %37 {strides = array<i32>} : memref<32x32xbf16, #tpu.memory_space<vmem>>, vector<32x32xbf16>,
    } else {
    }
    %c0 = arith.constant 0 : index
    %c0_1 = arith.constant 0 : index
    %3 = vector.load %arg8[%c0, %c0_1] : memref<32x32xbf16, #tpu.memory_space<vmem>>, vector<32x32xbf16>
    %c0_2 = arith.constant 0 : index
    %c0_3 = arith.constant 0 : index
    %4 = vector.load %arg5[%c0_2, %c0_3] : memref<32x128xbf16, #tpu.memory_space<vmem>>, vector<32x128xbf16>
    %cst = arith.constant dense<0.000000e+00> : vector<32x128xf32>
    %5 = tpu.matmul %3, %4, %cst {dimension_numbers = #tpu.dot_dimension_numbers<[1], [0], [0], [1], [0, 0, 1, 1], [], []>} : vector<32x32xbf16>, vector<32x128xbf16>, vector<32x128xf32> -> vector<32x128xf32>
    %c0_4 = arith.constant 0 : index
    %c0_5 = arith.constant 0 : index
    %6 = vector.load %arg6[%c0_4, %c0_5] : memref<1x128xf32, #tpu.memory_space<vmem>>, vector<1x128xf32>
    %7 = vector.broadcast %6 : vector<1x128xf32> to vector<32x128xf32>
    %8 = arith.addf %5, %7 : vector<32x128xf32>
    %c0_6 = arith.constant 0 : index
    %c0_7 = arith.constant 0 : index
    %9 = vector.load %arg7[%c0_6, %c0_7] : memref<32x128xf32, #tpu.memory_space<vmem>>, vector<32x128xf32>
    tpu.vector_store %arg7[%c0_6, %c0_7], %8 {strides = array<i32>} : memref<32x128xf32, #tpu.memory_space<vmem>>, vector<32x128xf32>,
    return
  }
  func.func @transform_0(%arg0: i32, %arg1: i32) -> (i32, i32) {
    %c0_i32 = arith.constant 0 : i32
    %c0_i32_0 = arith.constant 0 : i32
    return %arg0, %c0_i32 : i32, i32
  }
  func.func @transform_1(%arg0: i32, %arg1: i32) -> (i32, i32) {
    %c0_i32 = arith.constant 0 : i32
    %c0_i32_0 = arith.constant 0 : i32
    %c0_i32_1 = arith.constant 0 : i32
    return %c0_i32, %c0_i32_0 : i32, i32
  }
  func.func @transform_2(%arg0: i32, %arg1: i32) -> (i32, i32) {
    %c0_i32 = arith.constant 0 : i32
    %c0_i32_0 = arith.constant 0 : i32
    %c0_i32_1 = arith.constant 0 : i32
    return %c0_i32, %c0_i32_0 : i32, i32
  }
  func.func @transform_3(%arg0: i32, %arg1: i32) -> (i32, i32) {
    %c0_i32 = arith.constant 0 : i32
    %c0_i32_0 = arith.constant 0 : i32
    return %c0_i32, %arg1 : i32, i32
  }
  func.func @transform_4(%arg0: i32, %arg1: i32) -> (i32, i32) {
    %c0_i32 = arith.constant 0 : i32
    %c0_i32_0 = arith.constant 0 : i32
    return %c0_i32, %arg1 : i32, i32
  }
  func.func @transform_5(%arg0: i32, %arg1: i32) -> (i32, i32) {
    %c0_i32 = arith.constant 0 : i32
    return %arg0, %arg1 : i32, i32
  }
}

</mosaic_0001>

<bundles_post_ra>
// kernel: tpu_custom_call.1
= control target key start
LH: loop header
LB: loop body
LE: loop exit
PB: predicated region body
PF: predicated region fallthrough
CT: control target
= control target key end

     0   :  { %10 = vsyncpa [#allocation4], 0  ;;  %s491_s0 = inlined_call_operand.hbm [shape: f32[32,32], index: 0, kind: input, shape index: {}]   ;;  %s492_s1 = inlined_call_operand.vmem [shape: f32[1,32], index: 1, kind: input, shape index: {}]   ;;  %s493_s2 = inlined_call_operand.vmem [shape: f32[1,32], index: 2, kind: input, shape index: {}]   ;;  %s494_s3 = inlined_call_operand.hbm [shape: bf16[32,128], index: 3, kind: input, shape index: {}]   ;;  %s495_s4 = inlined_call_operand.vmem [shape: f32[1,128], index: 4, kind: input, shape index: {}]   ;;  %s496_s5 = inlined_call_operand.hbm [shape: f32[32,128], index: 5, kind: output, shape index: {}]  }
   0x1   :  { %11 = vsyncpa [#allocation7], 0 }
   0x2   :  { %12 = vsyncpa [#allocation5], 0  ;;  %s396_s18 = smov [#allocation3]  }
   0x3   :  { %s18_s19 = sshll.u32 %s396_s18, 4  ;;  %s19_s19 = int_to_ptr.vmem [resolvable:$true] %s18_s19 }
   0x4   :  { %s338_s20 = scalar_lea.vmem %s19_s19, 512  ;;  %p343_p1 = scmp.lt.s32.totalorder %s19_s19, %s19_s19 }
   0x5   :  { %p339_p0 = scmp.ne.s32.totalorder %s19_s19, %s338_s20  ;;  %p344_p2 = scmp.lt.s32.totalorder %s338_s20, %s338_s20 }
   0x7   :  { %p345_p3 = por %p344_p2, %p343_p1 }
   0x9   :  { %p346_p4 = pnand %p345_p3, %p339_p0 }
   0xb   :  { %349 = shalt.err (!%p346_p4)
}
   0xc   :  { %s397_s21 = smov 128   ;;  %s398_s22 = smov 8  }
   0xd   :  { %24 = dma.hbm_to_vmem [thread:$0]  %s491_s0, 512, %s19_s19, [#allocation4], %s397_s21, %s397_s21, %s398_s22  }
   0xe   :  { %s399_s25 = smov [#allocation6]  }
   0xf   :  { %s34_s26 = sshll.u32 %s399_s25, 4  ;;  %s35_s26 = int_to_ptr.vmem [resolvable:$true] %s34_s26 }
  0x10   :  { %s358_s27 = scalar_lea.vmem %s35_s26, 256  ;;  %p363_p6 = scmp.lt.s32.totalorder %s35_s26, %s35_s26 }
  0x11   :  { %p359_p5 = scmp.ne.s32.totalorder %s35_s26, %s358_s27  ;;  %p364_p7 = scmp.lt.s32.totalorder %s358_s27, %s358_s27 }
  0x13   :  { %p365_p8 = por %p364_p7, %p363_p6 }
  0x15   :  { %p366_p9 = pnand %p365_p8, %p359_p5 }
  0x17   :  { %369 = shalt.err (!%p366_p9)
}
  0x18   :  { %s400_s28 = smov 64   ;;  %s401_s29 = smov 4  }
  0x19   :  { %40 = dma.hbm_to_vmem [thread:$0]  %s494_s3, 256, %s35_s26, [#allocation7], %s400_s28, %s400_s28, %s401_s29  }
  0x1a   :  { %390 = dma.done.wait [#allocation4], 512  }
  0x1b   :  { %391 = vsyncadd [#allocation4], 4294966784 }
  0x1c   :  { %392 = dma.done.wait [#allocation7], 256  }
  0x1d   :  { %393 = vsyncadd [#allocation7], 4294967040  ;;  %vm58_vm0 = vcmask 261120   ;;  %v442_v0 = vld [vmem:[#allocation3 + $0x10] sm:$0xff]  ;;  %v444_v1 = vld [vmem:[#allocation3] sm:$0xff]  ;;  %vm162_vm1 = vcmask 257024  }
  0x1e   :  { %v446_v2 = vld [vmem:[#allocation3 + $0x18] sm:$0xff]  ;;  %v65_v3 = vsel %vm58_vm0, %v442_v0, 0.0  ;;  %v59_v4 = vsel %vm58_vm0, %v444_v1, 0.0  ;;  %v452_v5 = vld [vmem:[#allocation3 + $0x8] sm:$0xff]  ;;  %v76_v9 = vmul.f32 %v444_v1, %v444_v1  ;;  %v78_v13 = vmul.f32 %v442_v0, %v442_v0  ;;  %v319_v17 = vld [vmem:[#allocation6] sm:$0xff]   ;;  %s402_s9 = smov [#allocation8]  }
  0x1f   :  { %66 = vadd.xlane.f32.xlu1 %v65_v3  ;;  %60 = vadd.xlane.f32.xlu0 %v59_v4  ;;  %v68_v6 = vsel %vm58_vm0, %v446_v2, 0.0  ;;  %v62_v7 = vsel %vm58_vm0, %v452_v5, 0.0  ;;  %v77_v8 = vmul.f32 %v452_v5, %v452_v5  ;;  %v79_v12 = vmul.f32 %v446_v2, %v446_v2  ;;  %v318_v16 = vld [vmem:[#allocation6 + $0x8] sm:$0xff]   ;;  %v282_v53 = vld [vmem:[%s492_s1] ss:$0 sm:$0xff]  ;;  %s269_s10 = sshll.u32 %s402_s9, 4  ;;  %s270_s10 = int_to_ptr.vmem [resolvable:$true] %s269_s10 }
  0x20   :  { %v80_v11 = vsel %vm58_vm0, %v76_v9, 0.0  ;;  %v86_v15 = vsel %vm58_vm0, %v78_v13, 0.0  ;;  %303 = vmatprep.subr.bf16.mxu0 %v318_v16  ;;  %v283_v56 = vld [vmem:[%s493_s2] ss:$0 sm:$0xff]  ;;  %s370_s11 = scalar_lea.vmem %s270_s10, 512  ;;  %p375_p11 = scmp.lt.s32.totalorder %s270_s10, %s270_s10 }
  0x21   :  { %v83_v10 = vsel %vm58_vm0, %v77_v8, 0.0  ;;  %v89_v14 = vsel %vm58_vm0, %v79_v12, 0.0  ;;  %304 = vmatpush3.bf16.msra.mxu0 %v318_v16  ;;  %p371_p10 = scmp.ne.s32.totalorder %s270_s10, %s370_s11  ;;  %p376_p12 = scmp.lt.s32.totalorder %s370_s11, %s370_s11 }
  0x22   :  { %305 = vmatprep.subr.bf16.mxu0 %v319_v17 }
  0x23   :  { %69 = vadd.xlane.f32.xlu1 %v68_v6  ;;  %63 = vadd.xlane.f32.xlu0 %v62_v7  ;;  %p377_p13 = por %p376_p12, %p375_p11 }
  0x25   :  { %306 = vmatpush3.bf16.msra.mxu0 %v319_v17  ;;  %p378_p0 = pnand %p377_p13, %p371_p10 }
  0x27   :  { %84 = vadd.xlane.f32.xlu1 %v83_v10  ;;  %81 = vadd.xlane.f32.xlu0 %v80_v11 }
  0x2b   :  { %90 = vadd.xlane.f32.xlu1 %v89_v14  ;;  %87 = vadd.xlane.f32.xlu0 %v86_v15  ;;  %v288_v14 = vld [vmem:[%s495_s4] ss:$0 sm:$0xff] }
  0xa8   :  { %v67_v18 = vpop.xlane.xlu1 %66  ;;  %v61_v19 = vpop.xlane.xlu0 %60 }
  0xa9   :  { %v72_v22 = vmul.f32 0.03125, %v61_v19  ;;  %v74_v24 = vmul.f32 0.03125, %v67_v18 }
  0xab   :  { %v96_v28 = vmul.f32 %v72_v22, %v72_v22  ;;  %v98_v34 = vmul.f32 %v74_v24, %v74_v24  ;;  %v108_v52 = vsub.f32 %v444_v1, %v72_v22  ;;  %v110_v61 = vsub.f32 %v442_v0, %v74_v24 }
  0xac   :  { %v70_v20 = vpop.xlane.xlu1 %69  ;;  %v64_v21 = vpop.xlane.xlu0 %63 }
  0xad   :  { %v73_v23 = vmul.f32 0.03125, %v64_v21  ;;  %v75_v25 = vmul.f32 0.03125, %v70_v20 }
  0xaf   :  { %v97_v29 = vmul.f32 %v73_v23, %v73_v23  ;;  %v99_v35 = vmul.f32 %v75_v25, %v75_v25  ;;  %v109_v50 = vsub.f32 %v452_v5, %v73_v23  ;;  %v111_v58 = vsub.f32 %v446_v2, %v75_v25 }
  0xb0   :  { %v85_v26 = vpop.xlane.xlu1 %84  ;;  %v82_v27 = vpop.xlane.xlu0 %81 }
  0xb1   :  { %v93_v30 = vmul.f32 0.03125, %v85_v26  ;;  %v92_v31 = vmul.f32 0.03125, %v82_v27 }
  0xb3   :  { %v101_v32 = vsub.f32 %v93_v30, %v97_v29  ;;  %v100_v33 = vsub.f32 %v92_v31, %v96_v28 }
  0xb4   :  { %v91_v36 = vpop.xlane.xlu1 %90  ;;  %v88_v37 = vpop.xlane.xlu0 %87 }
  0xb5   :  { %v105_v38 = vmax.f32 %v101_v32, 0.0  ;;  %v104_v39 = vmax.f32 %v100_v33, 0.0  ;;  %v95_v40 = vmul.f32 0.03125, %v91_v36  ;;  %v94_v41 = vmul.f32 0.03125, %v88_v37 }
  0xb7   :  { %v113_v42 = vadd.f32 1e-05, %v105_v38  ;;  %v112_v43 = vadd.f32 1e-05, %v104_v39  ;;  %v103_v44 = vsub.f32 %v95_v40, %v99_v35  ;;  %v102_v45 = vsub.f32 %v94_v41, %v98_v34 }
  0xb9   :  { %322 = vrsqrt.f32 %v113_v42  ;;  %v107_v46 = vmax.f32 %v103_v44, 0.0  ;;  %v106_v47 = vmax.f32 %v102_v45, 0.0 }
  0xba   :  { %324 = vrsqrt.f32 %v112_v43 }
  0xbb   :  { %v115_v48 = vadd.f32 1e-05, %v107_v46  ;;  %v114_v49 = vadd.f32 1e-05, %v106_v47 }
  0xbd   :  { %326 = vrsqrt.f32 %v115_v48 }
  0xbe   :  { %328 = vrsqrt.f32 %v114_v49 }
  0xc6   :  { %v323_v51 = vpop.eup %322 }
  0xc7   :  { %v325_v54 = vpop.eup %324  ;;  %v121_v55 = vmul.f32 %v323_v51, %v109_v50 }
  0xc8   :  { %v120_v57 = vmul.f32 %v325_v54, %v108_v52 }
  0xc9   :  { %v132_v59 = vmul.f32 %v282_v53, %v121_v55 }
  0xca   :  { %v327_v60 = vpop.eup %326  ;;  %v131_v62 = vmul.f32 %v282_v53, %v120_v57 }
  0xcb   :  { %v329_v63 = vpop.eup %328  ;;  %v143_v1 = vadd.f32 %v283_v56, %v132_v59  ;;  %v123_v3 = vmul.f32 %v327_v60, %v111_v58 }
  0xcc   :  { %v142_v4 = vadd.f32 %v283_v56, %v131_v62  ;;  %v122_v5 = vmul.f32 %v329_v63, %v110_v61 }
  0xcd   :  { %v296_v6 = vpack.c.bf16 %v143_v1, %v143_v1  ;;  %v134_v7 = vmul.f32 %v282_v53, %v123_v3 }
  0xce   :  { %v295_v8 = vpack.c.bf16 %v142_v4, %v142_v4  ;;  %v133_v9 = vmul.f32 %v282_v53, %v122_v5 }
  0xcf   :  { %164 = vst.msk [vmem:[#allocation2 + $0x4] sm:$0xf] %vm162_vm1, %v296_v6  ;;  %v145_v10 = vadd.f32 %v283_v56, %v134_v7 }
  0xd0   :  { %163 = vst.msk [vmem:[#allocation2] sm:$0xf] %vm162_vm1, %v295_v8  ;;  %v144_v11 = vadd.f32 %v283_v56, %v133_v9 }
  0xd1   :  { %v298_v2 = vpack.c.bf16 %v145_v10, %v145_v10 }
  0xd2   :  { %v297_v12 = vpack.c.bf16 %v144_v11, %v144_v11 }
  0xd3   :  { %166 = vst.msk [vmem:[#allocation2 + $0xc] sm:$0xf] %vm162_vm1, %v298_v2 }
  0xd4   :  { %165 = vst.msk [vmem:[#allocation2 + $0x8] sm:$0xf] %vm162_vm1, %v297_v12 }
  0xd7   :  { %v320_v0 = vld [vmem:[#allocation2] sm:$0xff]  }
  0xd8   :  { %307 = vmatprep.mubr.msk.bf16.mxu0 %vm58_vm0, %v320_v0 }
  0xdb   :  { %v321_v13 = vld [vmem:[#allocation2 + $0x8] sm:$0xff]  }
  0xdc   :  { %308 = vmatmul.mubr.msk.bf16.vlgmr.msra.gmra.mxu0 %vm58_vm0, %v321_v13 }
 0x19c   :  { %v309_v15 = vpop.f32.mrf.mxu0 }
 0x19d   :  { %v254_v16 = vadd.f32 %v309_v15, %v288_v14 }
 0x19e   :  { %v245_v17 = vpop.f32.mrf.mxu0 }
 0x19f   :  { %262 = vst [vmem:[#allocation8 + $0x10] sm:$0xff] %v254_v16  ;;  %v246_v18 = vadd.f32 %v288_v14, %v245_v17 }
 0x1a0   :  { %v310_v19 = vpop.f32.mrf.mxu0 }
 0x1a1   :  { %260 = vst [vmem:[#allocation8] sm:$0xff] %v246_v18  ;;  %v257_v20 = vadd.f32 %v310_v19, %v288_v14 }
 0x1a2   :  { %v248_v21 = vpop.f32.mrf.mxu0 }
 0x1a3   :  { %263 = vst [vmem:[#allocation8 + $0x18] sm:$0xff] %v257_v20  ;;  %v249_v22 = vadd.f32 %v288_v14, %v248_v21 }
 0x1a5   :  { %261 = vst [vmem:[#allocation8 + $0x8] sm:$0xff] %v249_v22 }
 0x1a6   :  { %381 = shalt.err (!%p378_p0)
}
 0x1a7   :  { %275 = dma.vmem_to_hbm [thread:$0]  %s270_s10, 512, %s496_s5, [#allocation5], %s397_s21, %s397_s21, %s398_s22  }
 0x1a8   :  { %394 = dma.done.wait [#allocation5], 512  }
 0x1a9   :  { %395 = vsyncadd [#allocation5], 4294966784 }
 0x1aa   :  { %279 = vsyncpa [#allocation4], 1 }
 0x1ab   :  { %280 = vsyncpa [#allocation7], 1 }
 0x1ac   :  { %281 = vsyncpa [#allocation5], 1 }

</bundles_post_ra>
